<compile_context>
chip_gen: v5e
topology: v5e:2x2
jax: 0.10.0
libtpu: 0.0.40
codegen_flags: <defaults>
</compile_context>

<pallas_src>
import jax
import jax.numpy as jnp
from jax.experimental import pallas as pl
from jax.experimental.pallas import tpu as pltpu

# ----- module hyper-parameters (consistent with __init__) -----
INPUT_SIZE = 32
TOKEN_LENGTH = 8
OUTPUT_N = 8
R = 2
ALPHA = 32
SCALING = ALPHA / R          # LoRA scaling alpha / r
NEG_SLOPE = 0.01             # nn.LeakyReLU default

HIDDEN = TOKEN_LENGTH * OUTPUT_N // 2    # 32
OUT = TOKEN_LENGTH * OUTPUT_N            # 64
BATCH = 8


def _leaky_relu(x):
    # mul + max (2 VPU ops) instead of cmp + mul + select.
    return jnp.maximum(x, NEG_SLOPE * x)


def mapper_lora_kernel(x_ref, w1_ref, b1_ref, w2_ref, b2_ref, o_ref):
    x = x_ref[...]                                            # [B, D_in]

    # ---- layer 1: folded dense (base + LoRA) + bias + LeakyReLU ----
    h = _leaky_relu(
        jnp.dot(x, w1_ref[...], preferred_element_type=jnp.float32)
        + b1_ref[...]
    )                                                         # [B, HIDDEN]

    # ---- layer 2: folded dense (base + LoRA) + bias + LeakyReLU ----
    o_ref[...] = _leaky_relu(
        jnp.dot(h, w2_ref[...], preferred_element_type=jnp.float32)
        + b2_ref[...]
    )                                                         # [B, OUT]


def prepare_params(params):
    """One-time parameter prep: fold LoRA into the dense weights and lay
    everything out [in, out] so the kernel does no transposes.

    Exact at inference (LoRA dropout is identity)."""
    (w1, b1, a1, bb1, w2, b2, a2, bb2) = params
    w1_eff = w1.T + SCALING * (a1.T @ bb1.T)    # [D_in, HIDDEN]
    w2_eff = w2.T + SCALING * (a2.T @ bb2.T)    # [HIDDEN, OUT]
    return (
        jnp.asarray(w1_eff, jnp.float32),
        jnp.asarray(b1, jnp.float32).reshape(1, -1),   # [1, HIDDEN]
        jnp.asarray(w2_eff, jnp.float32),
        jnp.asarray(b2, jnp.float32).reshape(1, -1),   # [1, OUT]
    )


def mapper_lora_forward(x, prepped):
    """x: [B, INPUT_SIZE] float32, prepped = prepare_params(params) -> [B, OUT]."""
    w1_eff, b1, w2_eff, b2 = prepped
    vmem = pl.BlockSpec(memory_space=pltpu.MemorySpace.VMEM)
    return pl.pallas_call(
        mapper_lora_kernel,
        out_shape=jax.ShapeDtypeStruct((x.shape[0], OUT), jnp.float32),
        in_specs=[vmem] * 5,
        out_specs=vmem,
    )(x, w1_eff, b1, w2_eff, b2)


def init_params(key):
    ks = jax.random.split(key, 8)
    # nn.Linear weight layout: [out_features, in_features]; bias: [out_features]
    w1 = jax.random.normal(ks[0], (HIDDEN, INPUT_SIZE), jnp.float32) * 0.05
    b1 = jax.random.normal(ks[1], (HIDDEN,), jnp.float32) * 0.05
    a1 = jax.random.normal(ks[2], (R, INPUT_SIZE), jnp.float32) * 0.05   # lora_A
    bb1 = jax.random.normal(ks[3], (HIDDEN, R), jnp.float32) * 0.05      # lora_B
    w2 = jax.random.normal(ks[4], (OUT, HIDDEN), jnp.float32) * 0.05
    b2 = jax.random.normal(ks[5], (OUT,), jnp.float32) * 0.05
    a2 = jax.random.normal(ks[6], (R, HIDDEN), jnp.float32) * 0.05
    bb2 = jax.random.normal(ks[7], (OUT, R), jnp.float32) * 0.05
    return (w1, b1, a1, bb1, w2, b2, a2, bb2)


def reference_forward(x, params):
    """Pure-JAX reference of the original (unfolded) module math."""
    (w1, b1, a1, bb1, w2, b2, a2, bb2) = params
    h = x @ w1.T + b1 + SCALING * ((x @ a1.T) @ bb1.T)
    h = jnp.where(h > 0, h, NEG_SLOPE * h)
    o = h @ w2.T + b2 + SCALING * ((h @ a2.T) @ bb2.T)
    return jnp.where(o > 0, o, NEG_SLOPE * o)


if __name__ == "__main__":
    key = jax.random.PRNGKey(0)
    kx, kp = jax.random.split(key)
    x = jax.random.normal(kx, (BATCH, INPUT_SIZE), jnp.float32)
    params = init_params(kp)

    # One-time prep (fold LoRA, transpose, reshape biases) -- not per call.
    prepped = jax.tree_util.tree_map(jax.block_until_ready,
                                     prepare_params(params))

    out = mapper_lora_forward(x, prepped)
    out = jax.block_until_ready(out)

    ref = reference_forward(x, params)
    assert out.shape == (BATCH, OUT)
    assert jnp.allclose(out, ref, atol=1e-4, rtol=1e-4)
    print("KERNEL_OK")
</pallas_src>

<mosaic_0001>
module attributes {stable_mosaic.version = 11 : i64} {
  func.func @mapper_lora_kernel(%arg0: memref<8x32xf32, #tpu.memory_space<vmem>>, %arg1: memref<32x32xf32, #tpu.memory_space<vmem>>, %arg2: memref<1x32xf32, #tpu.memory_space<vmem>>, %arg3: memref<32x64xf32, #tpu.memory_space<vmem>>, %arg4: memref<1x64xf32, #tpu.memory_space<vmem>>, %arg5: memref<8x64xf32, #tpu.memory_space<vmem>>) attributes {dimension_semantics = [], scalar_prefetch = 0 : i64, scratch_operands = 0 : i64, tpu.core_type = #tpu.core_type<tc>} {
    %c0 = arith.constant 0 : index
    %c0_0 = arith.constant 0 : index
    %0 = vector.load %arg0[%c0, %c0_0] : memref<8x32xf32, #tpu.memory_space<vmem>>, vector<8x32xf32>
    %c0_1 = arith.constant 0 : index
    %c0_2 = arith.constant 0 : index
    %1 = vector.load %arg1[%c0_1, %c0_2] : memref<32x32xf32, #tpu.memory_space<vmem>>, vector<32x32xf32>
    %cst = arith.constant dense<0.000000e+00> : vector<8x32xf32>
    %2 = tpu.matmul %0, %1, %cst {dimension_numbers = #tpu.dot_dimension_numbers<[1], [0], [0], [1], [0, 0, 1, 1], [], []>} : vector<8x32xf32>, vector<32x32xf32>, vector<8x32xf32> -> vector<8x32xf32>
    %c0_3 = arith.constant 0 : index
    %c0_4 = arith.constant 0 : index
    %3 = vector.load %arg2[%c0_3, %c0_4] : memref<1x32xf32, #tpu.memory_space<vmem>>, vector<1x32xf32>
    %4 = vector.broadcast %3 : vector<1x32xf32> to vector<8x32xf32>
    %5 = arith.addf %2, %4 : vector<8x32xf32>
    %cst_5 = arith.constant 0.00999999977 : f32
    %6 = vector.broadcast %cst_5 : f32 to vector<8x32xf32>
    %7 = arith.mulf %6, %5 : vector<8x32xf32>
    %8 = arith.maximumf %5, %7 : vector<8x32xf32>
    %c0_6 = arith.constant 0 : index
    %c0_7 = arith.constant 0 : index
    %9 = vector.load %arg3[%c0_6, %c0_7] : memref<32x64xf32, #tpu.memory_space<vmem>>, vector<32x64xf32>
    %cst_8 = arith.constant dense<0.000000e+00> : vector<8x64xf32>
    %10 = tpu.matmul %8, %9, %cst_8 {dimension_numbers = #tpu.dot_dimension_numbers<[1], [0], [0], [1], [0, 0, 1, 1], [], []>} : vector<8x32xf32>, vector<32x64xf32>, vector<8x64xf32> -> vector<8x64xf32>
    %c0_9 = arith.constant 0 : index
    %c0_10 = arith.constant 0 : index
    %11 = vector.load %arg4[%c0_9, %c0_10] : memref<1x64xf32, #tpu.memory_space<vmem>>, vector<1x64xf32>
    %12 = vector.broadcast %11 : vector<1x64xf32> to vector<8x64xf32>
    %13 = arith.addf %10, %12 : vector<8x64xf32>
    %cst_11 = arith.constant 0.00999999977 : f32
    %14 = vector.broadcast %cst_11 : f32 to vector<8x64xf32>
    %15 = arith.mulf %14, %13 : vector<8x64xf32>
    %16 = arith.maximumf %13, %15 : vector<8x64xf32>
    %c0_12 = arith.constant 0 : index
    %c0_13 = arith.constant 0 : index
    %17 = vector.load %arg5[%c0_12, %c0_13] : memref<8x64xf32, #tpu.memory_space<vmem>>, vector<8x64xf32>
    tpu.vector_store %arg5[%c0_12, %c0_13], %16 {strides = array<i32>} : memref<8x64xf32, #tpu.memory_space<vmem>>, vector<8x64xf32>,
    return
  }
}

</mosaic_0001>

<bundles_post_ra>
// kernel: tpu_custom_call.1
= control target key start
LH: loop header
LB: loop body
LE: loop exit
PB: predicated region body
PF: predicated region fallthrough
CT: control target
= control target key end

     0   :  { %10 = vsyncpa [#allocation3], 0  ;;  %s322_s0 = inlined_call_operand.hbm [shape: f32[8,32], index: 0, kind: input, shape index: {}]   ;;  %s323_s1 = inlined_call_operand.hbm [shape: f32[32,32], index: 1, kind: input, shape index: {}]   ;;  %s324_s2 = inlined_call_operand.vmem [shape: f32[1,32], index: 2, kind: input, shape index: {}]   ;;  %s325_s3 = inlined_call_operand.hbm [shape: f32[32,64], index: 3, kind: input, shape index: {}]   ;;  %s326_s4 = inlined_call_operand.vmem [shape: f32[1,64], index: 4, kind: input, shape index: {}]   ;;  %s327_s5 = inlined_call_operand.hbm [shape: f32[8,64], index: 5, kind: output, shape index: {}]  }
   0x1   :  { %11 = vsyncpa [#allocation6], 0  ;;  %s28_s20 = sshll.u32 %s323_s1, 4  ;;  %s29_s20 = int_to_ptr.hbm [resolvable:$true] %s28_s20 }
   0x2   :  { %12 = vsyncpa [#allocation4], 0  ;;  %s266_s21 = smov [#allocation5]   ;;  %s18_s25 = sshll.u32 %s322_s0, 4  ;;  %s19_s25 = int_to_ptr.hbm [resolvable:$true] %s18_s25 }
   0x3   :  { %s30_s22 = sshll.u32 %s266_s21, 4  ;;  %s267_s26 = smov 128   ;;  %s31_s22 = int_to_ptr.vmem [resolvable:$true] %s30_s22 }
   0x4   :  { %s268_s27 = smov 8   ;;  %s269_s28 = smov [#allocation2]  }
   0x5   :  { %36 = dma.hbm_to_vmem [thread:$0]  %s29_s20, 512, %s31_s22, [#allocation6], %s267_s26, %s267_s26, %s268_s27  }
   0x6   :  { %s20_s29 = sshll.u32 %s269_s28, 4  ;;  %s43_s7 = sshll.u32 %s325_s3, 4  ;;  %s21_s29 = int_to_ptr.vmem [resolvable:$true] %s20_s29  ;;  %s44_s7 = int_to_ptr.hbm [resolvable:$true] %s43_s7 }
   0x7   :  { %23 = dma.hbm_to_vmem [thread:$0]  %s19_s25, 128, %s21_s29, [#allocation3]  }
   0x8   :  { %s270_s1 = smov [#allocation7]  }
   0x9   :  { %s45_s8 = sshll.u32 %s270_s1, 4  ;;  %s46_s8 = int_to_ptr.vmem [resolvable:$true] %s45_s8 }
   0xa   :  { %51 = dma.hbm_to_vmem [thread:$0]  %s44_s7, 512, %s46_s8, [#allocation6], %s267_s26, %s267_s26, %s268_s27  }
   0xb   :  { %260 = dma.done.wait [#allocation3], 128  }
   0xc   :  { %261 = vsyncadd [#allocation3], 4294967168 }
   0xd   :  { %262 = dma.done.wait [#allocation6], 1024  }
   0xe   :  { %263 = vsyncadd [#allocation6], 4294966272  ;;  %v70_v0 = vld [vmem:[#allocation5 + $0x18] sm:$0xff]  ;;  %v69_v1 = vld [vmem:[#allocation5 + $0x10] sm:$0xff]  ;;  %vm75_vm0 = vcmask 261120   ;;  %s271_s11 = smov [#allocation8]  }
   0xf   :  { %91 = vmatpush.msra.mxu0 %v70_v0  ;;  %v68_v2 = vld [vmem:[#allocation5 + $0x8] sm:$0xff]  ;;  %v67_v3 = vld [vmem:[#allocation5] sm:$0xff]  ;;  %v66_v4 = vld [vmem:[#allocation2] sm:$0xff]  ;;  %s141_s12 = sshll.u32 %s271_s11, 4  ;;  %s143_s15 = sshll.u32 %s327_s5, 4  ;;  %vm134_vm1 = vcmask 523264   ;;  %s142_s12 = int_to_ptr.vmem [resolvable:$true] %s141_s12  ;;  %s144_s15 = int_to_ptr.hbm [resolvable:$true] %s143_s15 }
  0x10   :  { %v104_v5 = vld [vmem:[#allocation7 + $0x18] sm:$0xff]  ;;  %v103_v6 = vld [vmem:[#allocation7 + $0x10] sm:$0xff]  ;;  %v102_v7 = vld [vmem:[#allocation7 + $0x8] sm:$0xff] }
  0x11   :  { %92 = vmatpush.msra.mxu0 %v69_v1  ;;  %124 = vmatpush.msra.mxu1 %v104_v5  ;;  %v101_v8 = vld [vmem:[#allocation7] sm:$0xff]  ;;  %v162_v9 = vld [vmem:[%s324_s2] ss:$0 sm:$0xff] }
  0x12   :  { %v163_v14 = vld [vmem:[%s326_s4] ss:$0 sm:$0xff] }
  0x13   :  { %93 = vmatpush.msra.mxu0 %v68_v2  ;;  %125 = vmatpush.msra.mxu1 %v103_v6 }
  0x15   :  { %94 = vmatpush.msra.mxu0 %v67_v3  ;;  %126 = vmatpush.msra.mxu1 %v102_v7 }
  0x16   :  { %154 = vmatmul.msk.f32.vlgmr.msra.gmra.mxu0 %vm75_vm0, %v66_v4 }
  0x17   :  { %127 = vmatpush.msra.mxu1 %v101_v8 }
  0x93   :  { %v96_v10 = vpop.f32.mrf.mxu0 }
  0x94   :  { %v97_v11 = vadd.f32 %v162_v9, %v96_v10 }
  0x96   :  { %v99_v12 = vmul.f32 0.01, %v97_v11 }
  0x98   :  { %v100_v13 = vmax.f32 %v97_v11, %v99_v12 }
  0x9a   :  { %155 = vmatmul.msk.f32.vlgmr.msra.gmra.mxu1 %vm75_vm0, %v100_v13 }
 0x117   :  { %v129_v15 = vpop.f32.mrf.mxu1 }
 0x118   :  { %v130_v16 = vadd.f32 %v163_v14, %v129_v15 }
 0x11a   :  { %v132_v17 = vmul.f32 0.01, %v130_v16 }
 0x11c   :  { %v133_v18 = vmax.f32 %v130_v16, %v132_v17 }
 0x11e   :  { %135 = vst.msk [vmem:[#allocation8] sm:$0xff] %vm134_vm1, %v133_v18 }
 0x11f   :  { %146 = dma.vmem_to_hbm [thread:$0]  %s142_s12, 128, %s144_s15, [#allocation4]  }
 0x120   :  { %264 = dma.done.wait [#allocation4], 128  }
 0x121   :  { %265 = vsyncadd [#allocation4], 4294967168 }
 0x122   :  { %151 = vsyncpa [#allocation3], 1 }
 0x123   :  { %152 = vsyncpa [#allocation6], 1 }
 0x124   :  { %153 = vsyncpa [#allocation4], 1 }

</bundles_post_ra>
